<compile_context>
chip_gen: v6e
topology: v6e:2x2x1
jax: 0.10.0
libtpu: 0.0.40
codegen_flags: <defaults>
</compile_context>

<pallas_src>
import math
import functools

import jax
import jax.numpy as jnp
from jax import lax
from jax.experimental import pallas as pl
from jax.experimental.pallas import tpu as pltpu


def _detect_vmem_capacity_bytes():
    """Physical VMEM per core; conservative fallback (v7x = 64 MiB) if unknown."""
    try:
        info = pltpu.get_tpu_info()
        cap = getattr(info, "vmem_capacity_bytes", None)
        if cap:
            return int(cap)
    except Exception:
        pass
    return 64 << 20


_VMEM_PHYSICAL = _detect_vmem_capacity_bytes()
# ~8 MiB blocks amortize the ~0.35 us per-grid-step cost (<10% of a step at v7x HBM
# bandwidth); with >=128 MiB VMEM (v5e/v6e) we can afford 16 MiB blocks.
_DEFAULT_BLOCK_TARGET = (16 << 20) if _VMEM_PHYSICAL >= (128 << 20) else (8 << 20)


def _round_up(n, m):
    return ((n + m - 1) // m) * m


def _x3ds_kernel(x_ref, w_ref, b_ref, o_ref, acc_ref, *, t_blk, acc_rows, rem):
    """Streamed (T,H,W) sum -> fused mean + Linear(C,E) (MXU) -> exact GELU.

    x_ref  : [t_blk, C*HW]    one lane-dense chunk of the current batch element
    w_ref  : [C*HW, E]        fused/expanded weight (mean + channel segmentation folded in)
    b_ref  : [1, E]           fused bias
    o_ref  : [1, E]           output embedding row for this batch element
    acc_ref: [acc_rows, C*HW] per-batch partial-sum accumulator (VMEM scratch, f32)
    """
    t = pl.program_id(1)
    last = pl.num_programs(1) - 1
    chw = x_ref.shape[-1]

    @pl.when(t == 0)
    def _init():
        acc_ref[...] = jnp.zeros_like(acc_ref)

    def _accumulate(xb):
        # Pure element-wise VPU adds every grid step; no per-step XLU reduce.
        if acc_rows == t_blk:
            acc_ref[...] += xb
        else:
            # t_blk is a multiple of 8 here: a layout-free sublane-group split.
            acc_ref[...] += jnp.sum(
                xb.reshape(t_blk // acc_rows, acc_rows, chw), axis=0)

    x = x_ref[...].astype(jnp.float32)          # [t_blk, C*HW]

    if rem == t_blk:
        # T divides evenly into chunks: no masking anywhere.
        _accumulate(x)
    else:
        @pl.when(t != last)
        def _full():
            _accumulate(x)

        @pl.when(t == last)
        def _tail():
            # Mask the out-of-range frames of the ragged final chunk (OOB block
            # contents are unspecified), only paid on the last step.
            row = lax.broadcasted_iota(jnp.int32, x.shape, 0)
            _accumulate(jnp.where(row < rem, x, 0.0))

    @pl.when(t == last)
    def _finalize():
        # One small MXU matmul performs the mean scaling, per-channel pooling and
        # both fused Linears in a single shot; exact (erf) GELU matches nn.GELU().
        part = jnp.dot(acc_ref[...], w_ref[...],
                       preferred_element_type=jnp.float32)          # [acc_rows, E]
        proj = jnp.sum(part, axis=0, keepdims=True) + b_ref[...]    # [1, E]
        inv_sqrt2 = jnp.float32(1.0 / math.sqrt(2.0))
        o_ref[...] = (0.5 * proj * (1.0 + lax.erf(proj * inv_sqrt2))).astype(o_ref.dtype)


@functools.partial(jax.jit, static_argnames=("embedding_dim", "target_block_bytes"))
def x3ds_encoder_forward(item_content, wv, bv, wp, bp, *, embedding_dim,
                         target_block_bytes=None):
    """item_content: [B, T, C, H, W] (f32 or bf16), same layout as the PyTorch input."""
    B, T, C, H, W = item_content.shape
    HW = H * W
    CHW = C * HW
    E = embedding_dim

    # Free contiguous view -> lane-dense [t_blk, C*HW] blocks (no transposed copy;
    # the global (T,H,W) mean commutes with the module's transpose(1, 2)).
    x = item_content.reshape(B, T, CHW)

    # Fuse the two bias-only Linears, fold in the 1/(T*H*W) mean and expand per
    # channel so the in-kernel head is a single [*, C*HW] x [C*HW, E] matmul.
    inv_thw = jnp.float32(1.0 / float(T * HW))
    w_fused = jnp.dot(wv, wp, preferred_element_type=jnp.float32)         # [C, E]
    b_fused = jnp.dot(bv, wp, preferred_element_type=jnp.float32) + bp    # [1, E]
    w_exp = jnp.repeat(w_fused * inv_thw, HW, axis=0)                     # [C*HW, E]

    # ---- block / grid selection (all static) -------------------------------------
    itemsize = jnp.dtype(item_content.dtype).itemsize
    frame_bytes = CHW * itemsize
    target = _DEFAULT_BLOCK_TARGET if target_block_bytes is None else int(target_block_bytes)
    row_align = 8 * max(1, 4 // itemsize)         # sublane multiple for this dtype
    t_blk = max(1, target // frame_bytes)
    if t_blk >= T:
        t_blk = T                                  # single chunk: full-dim block is legal
    else:
        t_blk = max(row_align, (t_blk // row_align) * row_align)
    n_chunks = -(-T // t_blk)                      # cdiv; no divisor-of-T requirement
    rem = T - (n_chunks - 1) * t_blk               # valid frames in the last chunk
    acc_rows = 8 if t_blk % 8 == 0 else t_blk

    # ---- VMEM budget from the (8,128)-padded footprints ---------------------------
    chw_pad = _round_up(CHW, 128)
    e_pad = _round_up(E, 128)
    block_bytes = _round_up(t_blk, row_align) * chw_pad * itemsize
    acc_bytes = _round_up(acc_rows, 8) * chw_pad * 4
    w_bytes = _round_up(CHW, 8) * e_pad * 4        # constant-index, but budget 2x buffers
    small_bytes = 4 * 8 * e_pad * 4                # bias + output buffers
    need = 2 * block_bytes + acc_bytes + 2 * w_bytes + small_bytes + (4 << 20)
    cap = max((_VMEM_PHYSICAL * 3) // 4, 32 << 20)
    vmem_limit = int(min(max(need, 16 << 20), cap))

    kernel = functools.partial(_x3ds_kernel, t_blk=t_blk, acc_rows=acc_rows, rem=rem)

    out = pl.pallas_call(
        kernel,
        out_shape=jax.ShapeDtypeStruct((B, 1, E), jnp.float32),
        grid_spec=pltpu.PrefetchScalarGridSpec(
            num_scalar_prefetch=0,
            grid=(B, n_chunks),
            in_specs=[
                # lane-dense video chunks, auto double-buffered by Pallas
                pl.BlockSpec((None, t_blk, CHW), lambda b, t: (b, t, 0)),
                # fused weight/bias: constant block index, VMEM-resident (tiny here;
                # for a large real head prefer emitting pooled [B, C] and doing the
                # Linear+GELU as one batched MXU matmul outside this kernel).
                pl.BlockSpec((CHW, E), lambda b, t: (0, 0)),
                pl.BlockSpec((1, E), lambda b, t: (0, 0)),
            ],
            out_specs=pl.BlockSpec((None, 1, E), lambda b, t: (b, 0, 0)),
            scratch_shapes=[pltpu.VMEM((acc_rows, CHW), jnp.float32)],
        ),
        compiler_params=pltpu.CompilerParams(
            # TODO(synk): on v7x with B == 1 the second TensorCore idles; a 2-way
            #             split of the chunk axis with a partial-sum combine would
            #             recover it.
            dimension_semantics=("parallel", "arbitrary"),
            vmem_limit_bytes=vmem_limit,
        ),
    )(x, w_exp, b_fused)

    return out.reshape(B, E)


def init_params(key, in_channels, embedding_dim, num_classes=400):
    """Deterministic parameter init (mirrors xavier_normal_ / zeros in __init__)."""
    k_wv, k_wp = jax.random.split(key, 2)

    # Stand-in video_net head: Linear(C -> 400), xavier-normal style.
    std_v = math.sqrt(2.0 / (in_channels + num_classes))
    wv = std_v * jax.random.normal(k_wv, (in_channels, num_classes), jnp.float32)
    bv = jnp.zeros((1, num_classes), jnp.float32)

    # video_proj: Linear(400 -> embedding_dim), xavier_normal_ weight, zero bias.
    std_p = math.sqrt(2.0 / (num_classes + embedding_dim))
    wp = std_p * jax.random.normal(k_wp, (num_classes, embedding_dim), jnp.float32)
    bp = jnp.zeros((1, embedding_dim), jnp.float32)

    return wv, bv, wp, bp


if __name__ == "__main__":
    # Small shapes consistent with the forward pass: [B, T, C, H, W].
    # T=20 deliberately exercises the ragged-tail (T % t_blk != 0) path below.
    B, T, C, H, W = 2, 20, 3, 16, 16
    embedding_dim = 32

    key = jax.random.PRNGKey(0)
    k_x, k_p = jax.random.split(key)
    item_content = jax.random.normal(k_x, (B, T, C, H, W), jnp.float32)
    wv, bv, wp, bp = init_params(k_p, C, embedding_dim)

    # Pure-JAX reference of the un-fused math (transpose -> pool -> two Linears -> GELU).
    x_ref = jnp.transpose(item_content, (0, 2, 1, 3, 4)).reshape(B, C, T * H * W)
    pooled = jnp.mean(x_ref, axis=-1)
    proj = (pooled @ wv + bv) @ wp + bp
    ref = 0.5 * proj * (1.0 + lax.erf(proj / jnp.sqrt(2.0)))

    def check(out):
        out = jax.block_until_ready(out)
        assert out.shape == (B, embedding_dim), out.shape
        assert jnp.all(jnp.isfinite(out)), "non-finite output"
        assert jnp.allclose(out, ref, atol=3e-5, rtol=1e-3), \
            float(jnp.max(jnp.abs(out - ref)))

    frame_bytes = C * H * W * 4

    # 1) default block selection (single full-T chunk at these toy sizes)
    check(x3ds_encoder_forward(item_content, wv, bv, wp, bp,
                               embedding_dim=embedding_dim))

    # 2) forced 16-frame blocks: multi-chunk streaming, 8-row accumulator fold,
    #    ragged masked tail (t_blk=16, n_chunks=2, rem=4)
    check(x3ds_encoder_forward(item_content, wv, bv, wp, bp,
                               embedding_dim=embedding_dim,
                               target_block_bytes=16 * frame_bytes))

    # 3) forced 8-frame blocks: t_blk == acc_rows path + ragged tail (3 chunks, rem=4)
    check(x3ds_encoder_forward(item_content, wv, bv, wp, bp,
                               embedding_dim=embedding_dim,
                               target_block_bytes=8 * frame_bytes))

    print("KERNEL_OK")
</pallas_src>

<mosaic_0001>
module attributes {stable_mosaic.version = 11 : i64} {
  func.func @_x3ds_kernel(%arg0: i32, %arg1: i32, %arg2: memref<1x20x768xf32, #tpu.memory_space<vmem>>, %arg3: memref<768x32xf32, #tpu.memory_space<vmem>>, %arg4: memref<1x32xf32, #tpu.memory_space<vmem>>, %arg5: memref<1x1x32xf32, #tpu.memory_space<vmem>>, %arg6: memref<20x768xf32, #tpu.memory_space<vmem>>) attributes {dimension_semantics = [#tpu.dimension_semantics<parallel>, #tpu.dimension_semantics<arbitrary>], iteration_bounds = array<i64: 2, 1>, scalar_prefetch = 0 : i64, scratch_operands = 1 : i64, tpu.core_type = #tpu.core_type<tc>, window_params = [{transform_indices = @transform_0, window_bounds = array<i64: 1, 20, 768>}, {pipeline_mode = #tpu.pipeline_mode<synchronous>, transform_indices = @transform_1, window_bounds = array<i64: 768, 32>}, {pipeline_mode = #tpu.pipeline_mode<synchronous>, transform_indices = @transform_2, window_bounds = array<i64: 1, 32>}, {transform_indices = @transform_3, window_bounds = array<i64: 1, 1, 32>}]} {
    %c0_i32 = arith.constant 0 : i32
    %0 = arith.cmpi eq, %arg1, %c0_i32 : i32
    %1 = arith.extui %0 : i1 to i32
    %c0_i32_0 = arith.constant 0 : i32
    %2 = arith.cmpi ne, %1, %c0_i32_0 : i32
    scf.if %2 {
      %cst = arith.constant 0.000000e+00 : f32
      %11 = vector.broadcast %cst : f32 to vector<20x768xf32>
      %c0_9 = arith.constant 0 : index
      %c0_10 = arith.constant 0 : index
      %12 = vector.load %arg6[%c0_9, %c0_10] : memref<20x768xf32, #tpu.memory_space<vmem>>, vector<20x768xf32>
      tpu.vector_store %arg6[%c0_9, %c0_10], %11 {strides = array<i32>} : memref<20x768xf32, #tpu.memory_space<vmem>>, vector<20x768xf32>,
    } else {
    }
    %c0 = arith.constant 0 : index
    %c0_1 = arith.constant 0 : index
    %c0_2 = arith.constant 0 : index
    %3 = vector.load %arg2[%c0, %c0_1, %c0_2] : memref<1x20x768xf32, #tpu.memory_space<vmem>>, vector<1x20x768xf32>
    %4 = vector.shape_cast %3 : vector<1x20x768xf32> to vector<20x768xf32>
    %c0_3 = arith.constant 0 : index
    %c0_4 = arith.constant 0 : index
    %5 = vector.load %arg6[%c0_3, %c0_4] : memref<20x768xf32, #tpu.memory_space<vmem>>, vector<20x768xf32>
    %6 = arith.addf %5, %4 : vector<20x768xf32>
    %c0_5 = arith.constant 0 : index
    %c0_6 = arith.constant 0 : index
    %7 = vector.load %arg6[%c0_5, %c0_6] : memref<20x768xf32, #tpu.memory_space<vmem>>, vector<20x768xf32>
    tpu.vector_store %arg6[%c0_5, %c0_6], %6 {strides = array<i32>} : memref<20x768xf32, #tpu.memory_space<vmem>>, vector<20x768xf32>,
    %c0_i32_7 = arith.constant 0 : i32
    %8 = arith.cmpi eq, %arg1, %c0_i32_7 : i32
    %9 = arith.extui %8 : i1 to i32
    %c0_i32_8 = arith.constant 0 : i32
    %10 = arith.cmpi ne, %9, %c0_i32_8 : i32
    scf.if %10 {
      %c0_9 = arith.constant 0 : index
      %c0_10 = arith.constant 0 : index
      %11 = vector.load %arg6[%c0_9, %c0_10] : memref<20x768xf32, #tpu.memory_space<vmem>>, vector<20x768xf32>
      %c0_11 = arith.constant 0 : index
      %c0_12 = arith.constant 0 : index
      %12 = vector.load %arg3[%c0_11, %c0_12] : memref<768x32xf32, #tpu.memory_space<vmem>>, vector<768x32xf32>
      %cst = arith.constant dense<0.000000e+00> : vector<20x32xf32>
      %13 = tpu.matmul %11, %12, %cst {dimension_numbers = #tpu.dot_dimension_numbers<[1], [0], [0], [1], [0, 0, 1, 1], [], []>} : vector<20x768xf32>, vector<768x32xf32>, vector<20x32xf32> -> vector<20x32xf32>
      %cst_13 = arith.constant dense<0.000000e+00> : vector<32xf32>
      %14 = vector.multi_reduction <add>, %13, %cst_13 [0] : vector<20x32xf32> to vector<32xf32>
      %15 = vector.shape_cast %14 : vector<32xf32> to vector<1x32xf32>
      %c0_14 = arith.constant 0 : index
      %c0_15 = arith.constant 0 : index
      %16 = vector.load %arg4[%c0_14, %c0_15] : memref<1x32xf32, #tpu.memory_space<vmem>>, vector<1x32xf32>
      %17 = arith.addf %15, %16 : vector<1x32xf32>
      %cst_16 = arith.constant 5.000000e-01 : f32
      %18 = vector.broadcast %cst_16 : f32 to vector<1x32xf32>
      %19 = arith.mulf %18, %17 : vector<1x32xf32>
      %cst_17 = arith.constant 0.707106769 : f32
      %20 = vector.broadcast %cst_17 : f32 to vector<1x32xf32>
      %21 = arith.mulf %17, %20 : vector<1x32xf32>
      %22 = math.erf %21 : vector<1x32xf32>
      %cst_18 = arith.constant 1.000000e+00 : f32
      %23 = vector.broadcast %cst_18 : f32 to vector<1x32xf32>
      %24 = arith.addf %23, %22 : vector<1x32xf32>
      %25 = arith.mulf %19, %24 : vector<1x32xf32>
      %c0_19 = arith.constant 0 : index
      %c0_20 = arith.constant 0 : index
      %c0_21 = arith.constant 0 : index
      %26 = vector.load %arg5[%c0_19, %c0_20, %c0_21] : memref<1x1x32xf32, #tpu.memory_space<vmem>>, vector<1x1x32xf32>
      %27 = vector.shape_cast %26 : vector<1x1x32xf32> to vector<1x32xf32>
      %28 = vector.shape_cast %25 : vector<1x32xf32> to vector<1x1x32xf32>
      tpu.vector_store %arg5[%c0_19, %c0_20, %c0_21], %28 {strides = array<i32>} : memref<1x1x32xf32, #tpu.memory_space<vmem>>, vector<1x1x32xf32>,
    } else {
    }
    return
  }
  func.func @transform_0(%arg0: i32, %arg1: i32) -> (i32, i32, i32) {
    %c0_i32 = arith.constant 0 : i32
    %c0_i32_0 = arith.constant 0 : i32
    return %arg0, %arg1, %c0_i32 : i32, i32, i32
  }
  func.func @transform_1(%arg0: i32, %arg1: i32) -> (i32, i32) {
    %c0_i32 = arith.constant 0 : i32
    %c0_i32_0 = arith.constant 0 : i32
    %c0_i32_1 = arith.constant 0 : i32
    return %c0_i32, %c0_i32_0 : i32, i32
  }
  func.func @transform_2(%arg0: i32, %arg1: i32) -> (i32, i32) {
    %c0_i32 = arith.constant 0 : i32
    %c0_i32_0 = arith.constant 0 : i32
    %c0_i32_1 = arith.constant 0 : i32
    return %c0_i32, %c0_i32_0 : i32, i32
  }
  func.func @transform_3(%arg0: i32, %arg1: i32) -> (i32, i32, i32) {
    %c0_i32 = arith.constant 0 : i32
    %c0_i32_0 = arith.constant 0 : i32
    %c0_i32_1 = arith.constant 0 : i32
    return %arg0, %c0_i32, %c0_i32_0 : i32, i32, i32
  }
}

</mosaic_0001>

<bundles_post_ra>
// kernel: x3ds_encoder_forward.1
= control target key start
LH: loop header
LB: loop body
LE: loop exit
PB: predicated region body
PF: predicated region fallthrough
CT: control target
= control target key end

     0   :  { %8 = vsyncpa [#allocation4], 0  ;;  %s1519_s0 = inlined_call_operand.vmem [shape: f32[2,20,768], index: 0, kind: input, shape index: {}]   ;;  %s1520_s1 = inlined_call_operand.vmem [shape: f32[768,32], index: 1, kind: input, shape index: {}]   ;;  %s1521_s2 = inlined_call_operand.vmem [shape: f32[1,32], index: 2, kind: input, shape index: {}]   ;;  %s1522_s3 = inlined_call_operand.hbm [shape: f32[2,1,32], index: 3, kind: output, shape index: {}]  }
   0x1   :  { %10 = vsyncpa [#allocation4 + $0x1], 0  ;;  %s1080_s12 = smov 0   ;;  %s1082_s13 = smov 0  }
   0x2   :  { %s1084_s14 = smov 0   ;;  %s1086_s15 = smov 0  }
   0x3   :  { %s1088_s16 = smov 0   ;;  %s1090_s17 = smov 0  }
   0x4 LB: > { %s757_s18 = sadd.s32 4294967295, %s1056_s17   ;;  %s758_s19 = sadd.s32 4294967294, %s1056_s17   ;;  %s1056_s17 = sphi %s1090_s17, %s16_s17   ;;  %s1052_s16 = sphi %s1088_s16, %s1529_s16   ;;  %s1048_s15 = sphi %s1086_s15, %s1528_s15   ;;  %s1044_s14 = sphi %s1084_s14, %s1527_s14   ;;  %s1040_s13 = sphi %s1082_s13, %s1526_s13   ;;  %s1036_s12 = sphi %s1080_s12, %s1525_s12  }
   0x5   : > { %s28_s20 = sadd.s32 1, %s1052_s16  ;;  %s105_s21 = sadd.s32 1, %s1044_s14 }
   0x6   : > { %p30_p0 = scmp.ge.s32.totalorder %s28_s20, 2  ;;  %p115_p1 = scmp.ne.s32.totalorder %s1044_s14, %s1040_s13 }
   0x7   : > { %p116_p2 = scmp.eq.s32.totalorder %s757_s18, 1  ;;  %p121_p3 = scmp.ne.s32.totalorder %s1040_s13, %s1036_s12 }
   0x8   : > { %s1531_s20 = smov (%p30_p0, %s28_s20), 0  ;;  %p122_p5 = scmp.eq.s32.totalorder %s758_s19, 1 }
   0x9   : > { %p1120_p4 = por %p116_p2, %p115_p1  ;;  %s102_s23 = ssub.s32 %s1052_s16, %s1531_s20 }
   0xa   : > { %p761_p6 = scmp.ge.s32.totalorder %s1056_s17, 1  ;;  %p103_p7 = scmp.eq.s32.totalorder %s102_s23, 0 }
   0xb   : > { %p1127_p8 = por %p122_p5, %p121_p3  ;;  %p160_p9 = scmp.lt.s32.totalorder %s1056_s17, 3 }
   0xc   : > { %s1133_s25 = scalar_select %p103_p7, %s1044_s14, %s105_s21  }
   0xd   : > { %p161_p10 = pnand %p761_p6, %p160_p9 }
   0xe   : > { %p189_p11 = scmp.lt.s32.totalorder (!%p161_p10), %s1048_s15, 1  ;;  %s186_s21 = sand.u32 (!%p161_p10), 1, %s1040_s13  }
   0xf   : > { %164 = sbr.rel (%p161_p10) target bundleno = 347 (0x15b), region = 32  ;;  %s763_s23 = sshll.u32 (!%p161_p10), %s1048_s15, 4 }
  0x10   : > { %s187_s26 = scalar_lea.vmem (!%p161_p10), [#allocation3], %s186_s21  ;;  %s683_s6 = scalar_lea.hbm (!%p161_p10), %s1522_s3, %s763_s23 }
  0x11   : > { %s685_s29 = sshll.u32 (!%p161_p10), %s187_s26, 4  ;;  %s1059_s8 = smov (!%p161_p10), [#allocation3]   ;;  %s686_s29 = int_to_ptr.vmem [resolvable:$true] %s685_s29 }
  0x12   : > { %s980_s7 = scalar_lea.vmem (!%p161_p10), %s686_s29, 16 }
  0x13   : > { %p981_p12 = scmp.ne.s32.totalorder (!%p161_p10), %s686_s29, %s980_s7 }
  0x14   : > { %v345_v0 = vld [vmem:[%s1520_s1 + $0xf8] sm:$0xff]  ;;  %v344_v4 = vld [vmem:[%s1520_s1 + $0xf0] sm:$0xff]  ;;  %v1058_v6 = vmov 0.0   ;;  %v343_v9 = vld [vmem:[%s1520_s1 + $0xe8] sm:$0xff]  ;;  %s1217_s27 = scalar_select %p189_p11, %s1048_s15, 1  ;;  %vm650_vm0 = vcmask 261120  }
  0x15   : > { %v377_v1 = vld [vmem:[%s1520_s1 + $0x1f8] sm:$0xff]  ;;  %766 = vmatprep.subr.mxu0 %v345_v0  ;;  %v376_v5 = vld [vmem:[%s1520_s1 + $0x1f0] sm:$0xff]  ;;  %215 = vst [vmem:[#allocation2 + $0x10] sm:$0xf] %v1058_v6  ;;  %216 = vst [vmem:[#allocation2 + $0x48] sm:$0xf] %v1058_v6  ;;  %p982_p13 = pnand %p981_p12, %p1120_p4 }
  0x16   : > { %v329_v2 = vld [vmem:[%s1520_s1 + $0x78] sm:$0xff]  ;;  %807 = vmatprep.subr.mxu1 %v377_v1  ;;  %217 = vst [vmem:[#allocation2 + $0x30] sm:$0xf] %v1058_v6  ;;  %218 = vst [vmem:[#allocation2 + $0x18] sm:$0xf] %v1058_v6  ;;  %v328_v7 = vld [vmem:[%s1520_s1 + $0x70] sm:$0xff] }
  0x17   : > { %v361_v3 = vld [vmem:[%s1520_s1 + $0x178] sm:$0xff]  ;;  %219 = vst [vmem:[#allocation2 + $0x68] sm:$0xf] %v1058_v6  ;;  %220 = vst [vmem:[#allocation2 + $0x60] sm:$0xf] %v1058_v6  ;;  %767 = vmatpush3.msra.mxu0 %v329_v2  ;;  %v360_v8 = vld [vmem:[%s1520_s1 + $0x170] sm:$0xff]  ;;  %p983_p0 = pneg %p982_p13 }
  0x18   : > { %808 = vmatpush3.msra.mxu1 %v361_v3  ;;  %768 = vmatprep.subr.mxu0 %v344_v4  ;;  %v375_v10 = vld [vmem:[%s1520_s1 + $0x1e8] sm:$0xff]  ;;  %v342_v13 = vld [vmem:[%s1520_s1 + $0xe0] sm:$0xff]  ;;  %v341_v17 = vld [vmem:[%s1520_s1 + $0xd8] sm:$0xff]  ;;  %s921_s28 = smul.u32 144, %s1217_s27  ;;  %vm654_vm1 = vcmask 257024   ;;  %vm670_vm2 = vcmask 253952  }
  0x19   : > { %809 = vmatprep.subr.mxu1 %v376_v5  ;;  %v327_v11 = vld [vmem:[%s1520_s1 + $0x68] sm:$0xff]  ;;  %769 = vmatpush3.msra.mxu0 %v328_v7  ;;  %v374_v14 = vld [vmem:[%s1520_s1 + $0x1e0] sm:$0xff]  ;;  %v373_v18 = vld [vmem:[%s1520_s1 + $0x1d8] sm:$0xff]  ;;  %s984_s15 = sshll.u32 %s1059_s8, 4  ;;  %s985_s15 = int_to_ptr.vmem [resolvable:$false] %s984_s15 }
  0x1a   : > { %v359_v12 = vld [vmem:[%s1520_s1 + $0x168] sm:$0xff]  ;;  %810 = vmatpush3.msra.mxu1 %v360_v8  ;;  %770 = vmatprep.subr.mxu0 %v343_v9  ;;  %v326_v15 = vld [vmem:[%s1520_s1 + $0x60] sm:$0xff]  ;;  %v325_v19 = vld [vmem:[%s1520_s1 + $0x58] sm:$0xff]  ;;  %s1271_s4 = scalar_lea.vmem %s1519_s0, %s921_s28  ;;  %s986_s9 = scalar_lea.vmem %s985_s15, 32 }
  0x1b   : > { %811 = vmatprep.subr.mxu1 %v375_v10  ;;  %v358_v16 = vld [vmem:[%s1520_s1 + $0x160] sm:$0xff]  ;;  %771 = vmatpush3.msra.mxu0 %v327_v11  ;;  %v357_v20 = vld [vmem:[%s1520_s1 + $0x158] sm:$0xff]  ;;  %v340_v21 = vld [vmem:[%s1520_s1 + $0xd0] sm:$0xff]  ;;  %p987_p1 = scmp.lt.s32.totalorder %s686_s29, %s985_s15  ;;  %p988_p2 = scmp.lt.s32.totalorder %s986_s9, %s980_s7 }
  0x1c   : > { %812 = vmatpush3.msra.mxu1 %v359_v12  ;;  %772 = vmatprep.subr.mxu0 %v342_v13  ;;  %v372_v22 = vld [vmem:[%s1520_s1 + $0x1d0] sm:$0xff]  ;;  %v339_v25 = vld [vmem:[%s1520_s1 + $0xc8] sm:$0xff]  ;;  %v338_v29 = vld [vmem:[%s1520_s1 + $0xc0] sm:$0xff] }
  0x1d   : > { %813 = vmatprep.subr.mxu1 %v374_v14  ;;  %773 = vmatpush3.msra.mxu0 %v326_v15  ;;  %v324_v23 = vld [vmem:[%s1520_s1 + $0x50] sm:$0xff]  ;;  %v371_v26 = vld [vmem:[%s1520_s1 + $0x1c8] sm:$0xff]  ;;  %v370_v30 = vld [vmem:[%s1520_s1 + $0x1c0] sm:$0xff]  ;;  %p989_p3 = por %p988_p2, %p987_p1 }
  0x1e   : > { %814 = vmatpush3.msra.mxu1 %v358_v16  ;;  %774 = vmatprep.subr.mxu0 %v341_v17  ;;  %v356_v24 = vld [vmem:[%s1520_s1 + $0x150] sm:$0xff]  ;;  %v323_v27 = vld [vmem:[%s1520_s1 + $0x48] sm:$0xff]  ;;  %v322_v31 = vld [vmem:[%s1520_s1 + $0x40] sm:$0xff] }
  0x1f   : > { %815 = vmatprep.subr.mxu1 %v373_v18  ;;  %775 = vmatpush3.msra.mxu0 %v325_v19  ;;  %v355_v28 = vld [vmem:[%s1520_s1 + $0x148] sm:$0xff]  ;;  %v354_v32 = vld [vmem:[%s1520_s1 + $0x140] sm:$0xff]  ;;  %v337_v33 = vld [vmem:[%s1520_s1 + $0xb8] sm:$0xff]  ;;  %p990_p5 = pnand %p989_p3, %p983_p0 }
  0x20   : > { %816 = vmatpush3.msra.mxu1 %v357_v20  ;;  %776 = vmatprep.subr.mxu0 %v340_v21  ;;  %v369_v34 = vld [vmem:[%s1520_s1 + $0x1b8] sm:$0xff]  ;;  %v336_v37 = vld [vmem:[%s1520_s1 + $0xb0] sm:$0xff]  ;;  %v335_v41 = vld [vmem:[%s1520_s1 + $0xa8] sm:$0xff] }
  0x21   : > { %817 = vmatprep.subr.mxu1 %v372_v22  ;;  %777 = vmatpush3.msra.mxu0 %v324_v23  ;;  %v321_v35 = vld [vmem:[%s1520_s1 + $0x38] sm:$0xff]  ;;  %v368_v38 = vld [vmem:[%s1520_s1 + $0x1b0] sm:$0xff]  ;;  %v367_v42 = vld [vmem:[%s1520_s1 + $0x1a8] sm:$0xff] }
  0x22   : > { %818 = vmatpush3.msra.mxu1 %v356_v24  ;;  %778 = vmatprep.subr.mxu0 %v339_v25  ;;  %v353_v36 = vld [vmem:[%s1520_s1 + $0x138] sm:$0xff]  ;;  %v320_v39 = vld [vmem:[%s1520_s1 + $0x30] sm:$0xff]  ;;  %v319_v43 = vld [vmem:[%s1520_s1 + $0x28] sm:$0xff] }
  0x23   : > { %819 = vmatprep.subr.mxu1 %v371_v26  ;;  %779 = vmatpush3.msra.mxu0 %v323_v27  ;;  %v352_v40 = vld [vmem:[%s1520_s1 + $0x130] sm:$0xff]  ;;  %v351_v44 = vld [vmem:[%s1520_s1 + $0x128] sm:$0xff]  ;;  %v334_v45 = vld [vmem:[%s1520_s1 + $0xa0] sm:$0xff] }
  0x24   : > { %820 = vmatpush3.msra.mxu1 %v355_v28  ;;  %780 = vmatprep.subr.mxu0 %v338_v29  ;;  %v366_v46 = vld [vmem:[%s1520_s1 + $0x1a0] sm:$0xff]  ;;  %v333_v49 = vld [vmem:[%s1520_s1 + $0x98] sm:$0xff]  ;;  %v222_v50 = vld [vmem:[%s1271_s4 + $0x8] sm:$0xff] }
  0x25   : > { %821 = vmatprep.subr.mxu1 %v370_v30  ;;  %781 = vmatpush3.msra.mxu0 %v322_v31  ;;  %v318_v47 = vld [vmem:[%s1520_s1 + $0x20] sm:$0xff]  ;;  %v224_v51 = vld [vmem:[%s1271_s4 + $0x18] sm:$0xff]  ;;  %v223_v54 = vld [vmem:[%s1271_s4 + $0x10] sm:$0xff] }
  0x26   : > { %822 = vmatpush3.msra.mxu1 %v354_v32  ;;  %782 = vmatprep.subr.mxu0 %v337_v33  ;;  %v350_v48 = vld [vmem:[%s1520_s1 + $0x120] sm:$0xff]  ;;  %v365_v52 = vld [vmem:[%s1520_s1 + $0x198] sm:$0xff]  ;;  %v332_v57 = vld [vmem:[%s1520_s1 + $0x90] sm:$0xff] }
  0x27   : > { %823 = vmatprep.subr.mxu1 %v369_v34  ;;  %783 = vmatpush3.msra.mxu0 %v321_v35  ;;  %v221_v53 = vld [vmem:[%s1271_s4] sm:$0xff]  ;;  %v317_v55 = vld [vmem:[%s1520_s1 + $0x18] sm:$0xff]  ;;  %v364_v58 = vld [vmem:[%s1520_s1 + $0x190] sm:$0xff] }
  0x28   : > { %824 = vmatpush3.msra.mxu1 %v353_v36  ;;  %784 = vmatprep.subr.mxu0 %v336_v37  ;;  %v349_v56 = vld [vmem:[%s1520_s1 + $0x118] sm:$0xff]  ;;  %v316_v59 = vld [vmem:[%s1520_s1 + $0x10] sm:$0xff]  ;;  %v331_v61 = vld [vmem:[%s1520_s1 + $0x88] sm:$0xff] }
  0x29   : > { %825 = vmatprep.subr.mxu1 %v368_v38  ;;  %785 = vmatpush3.msra.mxu0 %v320_v39  ;;  %v348_v60 = vld [vmem:[%s1520_s1 + $0x110] sm:$0xff]  ;;  %v363_v62 = vld [vmem:[%s1520_s1 + $0x188] sm:$0xff]  ;;  %v330_v1 = vld [vmem:[%s1520_s1 + $0x80] sm:$0xff] }
  0x2a   : > { %826 = vmatpush3.msra.mxu1 %v352_v40  ;;  %786 = vmatprep.subr.mxu0 %v335_v41  ;;  %v315_v63 = vld [vmem:[%s1520_s1 + $0x8] sm:$0xff]  ;;  %v362_v2 = vld [vmem:[%s1520_s1 + $0x180] sm:$0xff]  ;;  %v1341_v4 = vld [vmem:[%s1271_s4 + $0x38] sm:$0xff] }
  0x2b   : > { %827 = vmatprep.subr.mxu1 %v367_v42  ;;  %787 = vmatpush3.msra.mxu0 %v319_v43  ;;  %v347_v0 = vld [vmem:[%s1520_s1 + $0x108] sm:$0xff]  ;;  %v314_v3 = vld [vmem:[%s1520_s1] sm:$0xff]  ;;  %v1350_v7 = vld [vmem:[%s1271_s4 + $0x30] sm:$0xff] }
  0x2c   : > { %828 = vmatpush3.msra.mxu1 %v351_v44  ;;  %788 = vmatprep.subr.mxu0 %v334_v45  ;;  %v346_v5 = vld [vmem:[%s1520_s1 + $0x100] sm:$0xff]  ;;  %v1347_v6 = vld [vmem:[%s1271_s4 + $0x48] sm:$0xff]  ;;  %v409_v8 = vld [vmem:[%s1520_s1 + $0x2f8] sm:$0xff] }
  0x2d   : > { %829 = vmatprep.subr.mxu1 %v366_v46  ;;  %789 = vmatpush3.msra.mxu0 %v318_v47  ;;  %v1356_v9 = vld [vmem:[%s1271_s4 + $0x40] sm:$0xff]  ;;  %v393_v10 = vld [vmem:[%s1520_s1 + $0x278] sm:$0xff]  ;;  %v234_v11 = vld [vmem:[%s1271_s4 + $0x68] sm:$0xf] }
  0x2e   : > { %830 = vmatpush3.msra.mxu1 %v350_v48  ;;  %790 = vmatprep.subr.mxu0 %v333_v49  ;;  %v252_v12 = vld [vmem:[#allocation2 + $0x48] sm:$0xf]  ;;  %v408_v13 = vld [vmem:[%s1520_s1 + $0x2f0] sm:$0xff]  ;;  %v236_v15 = vld [vmem:[%s1271_s4 + $0x78] sm:$0xf] }
  0x2f   : > { %831 = vmatprep.subr.mxu1 %v365_v52  ;;  %791 = vmatpush3.msra.mxu0 %v317_v55  ;;  %v270_v14 = vadd.f32 %v252_v12, %v234_v11  ;;  %v254_v16 = vld [vmem:[#allocation2 + $0x18] sm:$0xf]  ;;  %v233_v18 = vld [vmem:[%s1271_s4 + $0x60] sm:$0xf]  ;;  %v251_v19 = vld [vmem:[#allocation2 + $0x10] sm:$0xf] }
  0x30   : > { %832 = vmatpush3.msra.mxu1 %v349_v56  ;;  %792 = vmatprep.subr.mxu0 %v332_v57  ;;  %v272_v17 = vadd.f32 %v254_v16, %v236_v15  ;;  %v235_v20 = vld [vmem:[%s1271_s4 + $0x70] sm:$0xf]  ;;  %v269_v22 = vadd.f32 %v251_v19, %v233_v18  ;;  %v407_v24 = vld [vmem:[%s1520_s1 + $0x2e8] sm:$0xff]  ;;  %v406_v26 = vld [vmem:[%s1520_s1 + $0x2e0] sm:$0xff] }
  0x31   : > { %833 = vmatprep.subr.mxu1 %v364_v58  ;;  %793 = vmatpush3.msra.mxu0 %v316_v59  ;;  %v392_v21 = vld [vmem:[%s1520_s1 + $0x270] sm:$0xff]  ;;  %288 = vst [vmem:[#allocation2 + $0x48] sm:$0xf] %v270_v14  ;;  %v391_v25 = vld [vmem:[%s1520_s1 + $0x268] sm:$0xff]  ;;  %v390_v28 = vld [vmem:[%s1520_s1 + $0x260] sm:$0xff] }
  0x32   : > { %834 = vmatpush3.msra.mxu1 %v348_v60  ;;  %794 = vmatprep.subr.mxu0 %v331_v61  ;;  %v253_v23 = vld [vmem:[#allocation2 + $0x30] sm:$0xf]  ;;  %290 = vst [vmem:[#allocation2 + $0x18] sm:$0xf] %v272_v17  ;;  %287 = vst [vmem:[#allocation2 + $0x10] sm:$0xf] %v269_v22 }
  0x33   : > { %835 = vmatprep.subr.mxu1 %v363_v62  ;;  %795 = vmatpush3.msra.mxu0 %v315_v63  ;;  %v271_v27 = vadd.f32 %v253_v23, %v235_v20  ;;  %v1384_v29 = vld [vmem:[%s1271_s4 + $0x28] sm:$0xff]  ;;  %v1387_v30 = vld [vmem:[%s1271_s4 + $0x58] sm:$0xff]  ;;  %v1390_v31 = vld [vmem:[%s1271_s4 + $0x20] sm:$0xff] }
  0x34   : > { %836 = vmatpush3.msra.mxu1 %v347_v0  ;;  %796 = vmatprep.subr.mxu0 %v330_v1  ;;  %v1393_v32 = vld [vmem:[%s1271_s4 + $0x50] sm:$0xff]  ;;  %v238_v33 = vld [vmem:[%s1271_s4 + $0x88] sm:$0xf]  ;;  %v256_v34 = vld [vmem:[#allocation2 + $0x60] sm:$0xf] }
  0x35   : > { %837 = vmatprep.subr.mxu1 %v362_v2  ;;  %797 = vmatpush3.msra.mxu0 %v314_v3  ;;  %289 = vst [vmem:[#allocation2 + $0x30] sm:$0xf] %v271_v27  ;;  %v237_v35 = vld [vmem:[%s1271_s4 + $0x80] sm:$0xf]  ;;  %v255_v36 = vld [vmem:[#allocation2 + $0x68] sm:$0xf]  ;;  %v274_v38 = vadd.f32 %v256_v34, %v238_v33 }
  0x36   : > { %474 = vmatprep.mubr.f32.mxu0 %v222_v50  ;;  %838 = vmatpush3.msra.mxu1 %v346_v5  ;;  %v405_v37 = vld [vmem:[%s1520_s1 + $0x2d8] sm:$0xff]  ;;  %v273_v39 = vadd.f32 %v255_v36, %v237_v35  ;;  %v404_v41 = vld [vmem:[%s1520_s1 + $0x2d0] sm:$0xff]  ;;  %v403_v43 = vld [vmem:[%s1520_s1 + $0x2c8] sm:$0xff]  ;;  %s673_s4 = scalar_lea.sflag [#allocation4], %s186_s21 }
  0x37   : > { %554 = vmatprep.mubr.f32.mxu1 %v224_v51  ;;  %475 = vmatmul.mubr.f32.vlgmr.msra.gmra.mxu0 %v221_v53  ;;  %v389_v40 = vld [vmem:[%s1520_s1 + $0x258] sm:$0xff]  ;;  %292 = vst [vmem:[#allocation2 + $0x60] sm:$0xf] %v274_v38  ;;  %v388_v42 = vld [vmem:[%s1520_s1 + $0x250] sm:$0xff]  ;;  %v387_v44 = vld [vmem:[%s1520_s1 + $0x248] sm:$0xff] }
  0x38   : > { %555 = vmatmul.mubr.f32.vlgmr.msra.gmra.mxu1 %v223_v54  ;;  %848 = vmatprep.subr.mxu0 %v409_v8  ;;  %291 = vst [vmem:[#allocation2 + $0x68] sm:$0xf] %v273_v39  ;;  %v402_v45 = vld [vmem:[%s1520_s1 + $0x2c0] sm:$0xff]  ;;  %v401_v47 = vld [vmem:[%s1520_s1 + $0x2b8] sm:$0xff]  ;;  %v400_v49 = vld [vmem:[%s1520_s1 + $0x2b0] sm:$0xff] }
  0x39   : > { %889 = vmatprep.subr.mxu1 %v409_v8  ;;  %849 = vmatpush3.msra.mxu0 %v393_v10  ;;  %v386_v46 = vld [vmem:[%s1520_s1 + $0x240] sm:$0xff]  ;;  %v385_v48 = vld [vmem:[%s1520_s1 + $0x238] sm:$0xff]  ;;  %v384_v50 = vld [vmem:[%s1520_s1 + $0x230] sm:$0xff] }
  0x3a   : > { %905 = vmatpush3.msra.mxu1 %v393_v10  ;;  %850 = vmatprep.subr.mxu0 %v408_v13  ;;  %v399_v51 = vld [vmem:[%s1520_s1 + $0x2a8] sm:$0xff]  ;;  %v398_v53 = vld [vmem:[%s1520_s1 + $0x2a0] sm:$0xff]  ;;  %v397_v55 = vld [vmem:[%s1520_s1 + $0x298] sm:$0xff] }
  0x3b   : > { %890 = vmatprep.subr.mxu1 %v408_v13  ;;  %851 = vmatpush3.msra.mxu0 %v392_v21  ;;  %v383_v52 = vld [vmem:[%s1520_s1 + $0x228] sm:$0xff]  ;;  %v382_v54 = vld [vmem:[%s1520_s1 + $0x220] sm:$0xff]  ;;  %v311_v57 = vld [vmem:[#allocation2 + $0x18] sm:$0xf] }
  0x3c   : > { %906 = vmatpush3.msra.mxu1 %v392_v21  ;;  %852 = vmatprep.subr.mxu0 %v407_v24  ;;  %v309_v56 = vld [vmem:[#allocation2 + $0x48] sm:$0xf]  ;;  %v381_v58 = vld [vmem:[%s1520_s1 + $0x218] sm:$0xff]  ;;  %v308_v59 = vld [vmem:[#allocation2 + $0x10] sm:$0xf] }
  0x3d   : > { %891 = vmatprep.subr.mxu1 %v407_v24  ;;  %853 = vmatpush3.msra.mxu0 %v391_v25  ;;  %v310_v60 = vld [vmem:[#allocation2 + $0x30] sm:$0xf]  ;;  %v395_v63 = vld [vmem:[%s1520_s1 + $0x288] sm:$0xff]  ;;  %v394_v1 = vld [vmem:[%s1520_s1 + $0x280] sm:$0xff] }
  0x3e   : > { %907 = vmatpush3.msra.mxu1 %v391_v25  ;;  %854 = vmatprep.subr.mxu0 %v406_v26  ;;  %v396_v61 = vld [vmem:[%s1520_s1 + $0x290] sm:$0xff]  ;;  %v379_v0 = vld [vmem:[%s1520_s1 + $0x208] sm:$0xff]  ;;  %v378_v2 = vld [vmem:[%s1520_s1 + $0x200] sm:$0xff] }
  0x3f   : > { %892 = vmatprep.subr.mxu1 %v406_v26  ;;  %855 = vmatpush3.msra.mxu0 %v390_v28  ;;  %v380_v62 = vld [vmem:[%s1520_s1 + $0x210] sm:$0xff]  ;;  %v313_v3 = vld [vmem:[#allocation2 + $0x60] sm:$0xf] }
  0x40   : > { %908 = vmatpush3.msra.mxu1 %v390_v28  ;;  %856 = vmatprep.subr.mxu0 %v405_v37 }
  0x41   : > { %893 = vmatprep.subr.mxu1 %v405_v37  ;;  %857 = vmatpush3.msra.mxu0 %v389_v40 }
  0x42   : > { %909 = vmatpush3.msra.mxu1 %v389_v40  ;;  %858 = vmatprep.subr.mxu0 %v404_v41 }
  0x43   : > { %894 = vmatprep.subr.mxu1 %v404_v41  ;;  %859 = vmatpush3.msra.mxu0 %v388_v42 }
  0x44   : > { %910 = vmatpush3.msra.mxu1 %v388_v42  ;;  %860 = vmatprep.subr.mxu0 %v403_v43 }
  0x45   : > { %895 = vmatprep.subr.mxu1 %v403_v43  ;;  %861 = vmatpush3.msra.mxu0 %v387_v44 }
  0x46   : > { %911 = vmatpush3.msra.mxu1 %v387_v44  ;;  %862 = vmatprep.subr.mxu0 %v402_v45 }
  0x47   : > { %896 = vmatprep.subr.mxu1 %v402_v45  ;;  %863 = vmatpush3.msra.mxu0 %v386_v46 }
  0x48   : > { %912 = vmatpush3.msra.mxu1 %v386_v46  ;;  %864 = vmatprep.subr.mxu0 %v401_v47 }
  0x49   : > { %897 = vmatprep.subr.mxu1 %v401_v47  ;;  %865 = vmatpush3.msra.mxu0 %v385_v48 }
  0x4a   : > { %913 = vmatpush3.msra.mxu1 %v385_v48  ;;  %866 = vmatprep.subr.mxu0 %v400_v49  ;;  %v663_v48 = vld [vmem:[%s1521_s2] sm:$0x1] }
  0x4b   : > { %898 = vmatprep.subr.mxu1 %v400_v49  ;;  %867 = vmatpush3.msra.mxu0 %v384_v50 }
  0x4c   : > { %914 = vmatpush3.msra.mxu1 %v384_v50  ;;  %868 = vmatprep.subr.mxu0 %v399_v51 }
  0x4d   : > { %899 = vmatprep.subr.mxu1 %v399_v51  ;;  %479 = vmatprep.mubr.f32.mxu0 %v1341_v4  ;;  %v312_v4 = vld [vmem:[#allocation2 + $0x68] sm:$0xf] }
  0x4e   : > { %559 = vmatprep.mubr.f32.mxu1 %v1347_v6  ;;  %869 = vmatpush3.msra.mxu0 %v383_v52 }
  0x4f   : > { %915 = vmatpush3.msra.mxu1 %v383_v52  ;;  %480 = vmatmul.mubr.f32.gmra.mxu0 %v1350_v7 }
  0x50   : > { %560 = vmatmul.mubr.f32.gmra.mxu1 %v1356_v9  ;;  %870 = vmatprep.subr.mxu0 %v398_v53 }
  0x51   : > { %900 = vmatprep.subr.mxu1 %v398_v53  ;;  %871 = vmatpush3.msra.mxu0 %v382_v54 }
  0x52   : > { %916 = vmatpush3.msra.mxu1 %v382_v54  ;;  %872 = vmatprep.subr.mxu0 %v397_v55 }
  0x53   : > { %901 = vmatprep.subr.mxu1 %v397_v55  ;;  %484 = vmatprep.mubr.f32.mxu0 %v309_v56 }
  0x54   : > { %564 = vmatprep.mubr.f32.mxu1 %v311_v57  ;;  %873 = vmatpush3.msra.mxu0 %v381_v58 }
  0x55   : > { %917 = vmatpush3.msra.mxu1 %v381_v58  ;;  %485 = vmatmul.mubr.f32.gmra.mxu0 %v308_v59 }
  0x56   : > { %565 = vmatmul.mubr.f32.gmra.mxu1 %v310_v60  ;;  %874 = vmatprep.subr.mxu0 %v396_v61 }
  0x57   : > { %902 = vmatprep.subr.mxu1 %v396_v61  ;;  %875 = vmatpush3.msra.mxu0 %v380_v62 }
  0x58   : > { %918 = vmatpush3.msra.mxu1 %v380_v62  ;;  %876 = vmatprep.subr.mxu0 %v395_v63 }
  0x59   : > { %903 = vmatprep.subr.mxu1 %v395_v63  ;;  %877 = vmatpush3.msra.mxu0 %v379_v0 }
  0x5a   : > { %919 = vmatpush3.msra.mxu1 %v379_v0  ;;  %878 = vmatprep.subr.mxu0 %v394_v1 }
  0x5b   : > { %904 = vmatprep.subr.mxu1 %v394_v1  ;;  %879 = vmatpush3.msra.mxu0 %v378_v2 }
  0x5c   : > { %920 = vmatpush3.msra.mxu1 %v378_v2  ;;  %634 = vmatprep.mubr.f32.mxu0 %v1384_v29 }
  0x5d   : > { %639 = vmatprep.mubr.f32.mxu1 %v1387_v30  ;;  %635 = vmatmul.mubr.f32.vlgmr.msra.gmra.mxu0 %v1390_v31 }
  0x5e   : > { %640 = vmatmul.mubr.f32.vlgmr.msra.gmra.mxu1 %v1393_v32 }
  0x5f   : > { %644 = vmatprep.mubr.f32.mxu1 %v313_v3 }
  0x62   : > { %645 = vmatmul.mubr.f32.gmra.mxu1 %v312_v4 }
  0xf7   : > { %v798_v5 = vpop.f32.mrf.mxu0 }
  0xf8   : > { %v839_v6 = vpop.f32.mrf.mxu1 }
  0xf9   : > { %v799_v7 = vpop.f32.mrf.mxu0 }
  0xfa   : > { %v840_v8 = vpop.f32.mrf.mxu1  ;;  %v800_v15 = vadd.f32 %v799_v7, %v798_v5 }
  0xfb   : > { %v841_v16 = vadd.f32 %v840_v8, %v839_v6 }
  0xfd   : > { %v557_v23 = vadd.f32 %v841_v16, %v800_v15 }
 0x10f   : > { %v801_v9 = vpop.f32.mrf.mxu0 }
 0x110   : > { %v842_v10 = vpop.f32.mrf.mxu1 }
 0x111   : > { %v802_v11 = vpop.f32.mrf.mxu0 }
 0x112   : > { %v843_v12 = vpop.f32.mrf.mxu1  ;;  %v803_v17 = vadd.f32 %v802_v11, %v801_v9 }
 0x113   : > { %v844_v18 = vadd.f32 %v843_v12, %v842_v10 }
 0x115   : > { %v804_v13 = vpop.f32.mrf.mxu0  ;;  %v562_v24 = vadd.f32 %v844_v18, %v803_v17 }
 0x116   : > { %v845_v14 = vpop.f32.mrf.mxu1 }
 0x117   : > { %v805_v19 = vpop.f32.mrf.mxu0 }
 0x118   : > { %v846_v20 = vpop.f32.mrf.mxu1  ;;  %v806_v27 = vadd.f32 %v805_v19, %v804_v13 }
 0x119   : > { %v847_v28 = vadd.f32 %v846_v20, %v845_v14 }
 0x11b   : > { %v567_v35 = vadd.f32 %v847_v28, %v806_v27 }
 0x11d   : > { %v880_v21 = vpop.f32.mrf.mxu0 }
 0x11e   : > { %v883_v22 = vpop.f32.mrf.mxu1 }
 0x11f   : > { %v881_v25 = vpop.f32.mrf.mxu0 }
 0x120   : > { %v884_v26 = vpop.f32.mrf.mxu1  ;;  %v882_v29 = vadd.f32 %v881_v25, %v880_v21 }
 0x121   : > { %v885_v30 = vadd.f32 %v884_v26, %v883_v22 }
 0x122   : > { %v886_v31 = vpop.f32.mrf.mxu1  ;;  %v637_v32 = vadd.f32 %v882_v29, %v557_v23 }
 0x123   : > { %v642_v33 = vadd.f32 %v885_v30, %v562_v24 }
 0x124   : > { %v887_v34 = vpop.f32.mrf.mxu1  ;;  %v651_v36 = vsel %vm650_vm0, %v637_v32, 0.0 }
 0x125   : > { %v652_v37 = vsel %vm650_vm0, %v642_v33, 0.0  ;;  %v888_v38 = vadd.f32 %v887_v34, %v886_v31 }
 0x126   : > { %v653_v40 = vadd.f32 %v652_v37, %v651_v36 }
 0x127   : > { %v647_v39 = vadd.f32 %v888_v38, %v567_v35 }
 0x129   : > { %v655_v41 = vsel %vm654_vm1, %v647_v39, 0.0 }
 0x12a   : > { %v656_v42 = vadd.f32 %v655_v41, %v653_v40 }
 0x12c   : > { %v657_v43 = vrot.slane %v656_v42, 4 }
 0x12e   : > { %v658_v44 = vadd.f32 %v657_v43, %v656_v42 }
 0x130   : > { %v659_v45 = vrot.slane %v658_v44, 2 }
 0x132   : > { %v660_v46 = vadd.f32 %v659_v45, %v658_v44 }
 0x134   : > { %v661_v47 = vrot.slane %v660_v46, 1 }
 0x136   : > { %v662_v49 = vadd.f32 %v661_v47, %v660_v46 }
 0x138   : > { %v664_v50 = vadd.f32 %v663_v48, %v662_v49 }
 0x13a   : > { %v666_v51 = vmul.f32 0.70710677, %v664_v50  ;;  %v665_v53 = vmul.f32 0.5, %v664_v50 }
 0x13c   : > { %978 = verf.f32 %v666_v51 }
 0x149   : > { %v979_v52 = vpop.eup %978 }
 0x14a   : > { %v668_v54 = vadd.f32 1.0, %v979_v52 }
 0x14c   : > { %v669_v55 = vmul.f32 %v668_v54, %v665_v53 }
 0x14e   : > { %671 = vst.msk [vmem:[%s187_s26] sm:$0x1] %vm670_vm2, %v669_v55 }
 0x14f   : > { %993 = shalt.err (!%p990_p5)
}
 0x150   : > { %s994_s27 = scalar_lea.hbm %s683_s6, 16  ;;  %s998_s11 = scalar_lea.hbm %s1522_s3, 32 }
 0x151   : > { %p995_p6 = scmp.ne.s32.totalorder %s683_s6, %s994_s27  ;;  %p999_p10 = scmp.lt.s32.totalorder %s683_s6, %s1522_s3 }
 0x152   : > { %p1000_p11 = scmp.lt.s32.totalorder %s998_s11, %s994_s27 }
 0x153   : > { %p996_p7 = pnand %p995_p6, %p1120_p4 }
 0x154   : > { %p1001_p12 = por %p1000_p11, %p999_p10 }
 0x155   : > { %p997_p9 = pneg %p996_p7 }
 0x157   : > { %p1002_p13 = pnand %p1001_p12, %p997_p9 }
 0x159   : > { %1005 = shalt.err (!%p1002_p13)
}
 0x15a   : > { %922 = dma.vmem_to_hbm [thread:$0]  (%p1120_p4), %s686_s29, 16, %s683_s6, %s673_s4  }
 0x15b PF: > { %p928_p0 = scmp.ge.s32.totalorder %s1056_s17, 2  ;;  %s697_s21 = sand.u32 1, %s1036_s12  }
 0x15c   : > { %s698_s23 = scalar_lea.sflag [#allocation4], %s697_s21 }
 0x15d   : > { %p925_p1 = pnand %p928_p0, %p1127_p8 }
 0x15f   : > { %p926_p2 = pneg %p925_p1 }
 0x161   : > { %1031 = dma.done.wait (%p926_p2), %s698_s23, 16  }
 0x162   : > { %1033 = vsyncadd (%p926_p2), %s698_s23, 4294967280  ;;  %s16_s17 = sadd.s32 1, %s1056_s17   ;;  %s1525_s12 = smov %s1040_s13 }
 0x163   : > { %p13_p3 = scmp.ge.s32.totalorder %s16_s17, 4   ;;  %s1526_s13 = smov %s1044_s14 }
 0x164   : > { %s1527_s14 = smov %s1133_s25  ;;  %s1528_s15 = smov %s1052_s16 }
 0x165   : > { %s1529_s16 = smov %s1531_s20  ;;  %15 = sbr.rel (!%p13_p3) target bundleno = 4 (0x4), region = 75 }
 0x16a   :  { %702 = vsyncpa [#allocation4], 1 }
 0x16b   :  { %704 = vsyncpa [#allocation4 + $0x1], 1 }

</bundles_post_ra>
